<compile_context>
chip_gen: v5e
topology: v5e:2x2
jax: 0.10.0
libtpu: 0.0.40
codegen_flags: <defaults>
</compile_context>

<pallas_src>
import math

import jax
import jax.numpy as jnp
from jax.experimental import pallas as pl
from jax.experimental.pallas import tpu as pltpu

# ----- T5 config (small, synthetic) -----
D_MODEL = 32
N_HEADS = 4
D_KV = 8
INNER = N_HEADS * D_KV          # 32
NUM_BUCKETS = 32
MAX_DISTANCE = 128
IS_DECODER = False              # encoder: bidirectional relative attention
BATCH = 2
SEQ = 8


def _t5_attention_kernel(x_ref, wq_ref, wk_ref, wv_ref, wo_ref, bias_ref,
                         o_ref, ctx_ref):
    """Single invocation, everything resident in VMEM.

    x_ref    : (B, S, D)      hidden states (compute dtype)
    wq/wk/wv : (H, D, dk)     per-head projection weights (x @ W layout)
    wo_ref   : (INNER, D)     untiled output projection weight
    bias_ref : (H, S, S)      relative position bias (fp32)
    o_ref    : (B*S, D)       flattened output
    ctx_ref  : (B*S, INNER)   VMEM scratch for head re-packing
    """
    B, S, D = x_ref.shape
    H, _, dk = wq_ref.shape
    N = B * H

    x = x_ref[...]                                                   # (B, S, D)
    cdt = x.dtype

    # Broadcast hidden states over heads onto a merged leading axis n = b*H + h.
    # Leading-dim broadcast + leading-dim merge only: no lane/sublane movement.
    x_bh = jnp.broadcast_to(x[:, None], (B, H, S, D)).reshape(N, S, D)

    def head_batched(w_ref):
        w = w_ref[...]                                               # (H, D, dk)
        return jnp.broadcast_to(w[None], (B, H, D, dk)).reshape(N, D, dk)

    # Per-head projections as batched matmuls; head axis is already leading,
    # zero in-kernel lane extraction.
    q = jnp.einsum('nsd,ndk->nsk', x_bh, head_batched(wq_ref),
                   preferred_element_type=jnp.float32).astype(cdt)   # (N, S, dk)
    k = jnp.einsum('nsd,ndk->nsk', x_bh, head_batched(wk_ref),
                   preferred_element_type=jnp.float32).astype(cdt)
    v = jnp.einsum('nsd,ndk->nsk', x_bh, head_batched(wv_ref),
                   preferred_element_type=jnp.float32).astype(cdt)

    # Attention scores (T5: no 1/sqrt(d_kv) scaling) + relative position bias
    # broadcast over batch (bias DMA'd once, not tiled B x in the wrapper).
    s = jnp.einsum('nqd,nkd->nqk', q, k,
                   preferred_element_type=jnp.float32)               # (N, S, S)
    bias = bias_ref[...]                                             # (H, S, S)
    s = s + jnp.broadcast_to(bias[None], (B, H, S, S)).reshape(N, S, S)

    # Exact fp32 softmax (matches softmax(scores.float(), dim=-1)).
    m = jnp.max(s, axis=-1, keepdims=True)
    e = jnp.exp(s - m)
    l = jnp.sum(e, axis=-1, keepdims=True)
    p = (e / l).astype(cdt)

    ctx = jnp.einsum('nqk,nkd->nqd', p, v,
                     preferred_element_type=jnp.float32)             # (N, S, dk)

    # Re-pack heads onto the lane axis: B*H static (S, dk) writes into VMEM
    # scratch, then ONE lane-denser matmul against the untiled Wo.
    for b in range(B):
        for h in range(H):
            ctx_ref[b * S:(b + 1) * S, h * dk:(h + 1) * dk] = (
                ctx[b * H + h].astype(ctx_ref.dtype))

    out = jnp.dot(ctx_ref[...], wo_ref[...],
                  preferred_element_type=jnp.float32)                # (B*S, D)
    o_ref[...] = out.astype(o_ref.dtype)


def prepare_t5_attention_params(wq, wk, wv, wo, compute_dtype=jnp.float32):
    """One-time weight preparation (hoisted out of the per-call wrapper).

    wq/wk/wv: (D_MODEL, INNER) in x @ W layout (== PyTorch x @ Linear.weight.T)
    wo:       (INNER, D_MODEL)
    Returns per-head (H, D, dk) weights + untiled Wo, in the compute dtype
    (use bfloat16 on v6e/v7x for ~2x MXU throughput; float32 for exact parity).
    """
    D, inner = wq.shape
    H, dk = N_HEADS, D_KV

    def per_head(w):
        return jnp.transpose(w.reshape(D, H, dk), (1, 0, 2)).astype(compute_dtype)

    return dict(wq=per_head(wq), wk=per_head(wk), wv=per_head(wv),
                wo=wo.astype(compute_dtype))


def t5_attention(hidden_states, params, position_bias):
    """hidden_states: (B, S, D); params: prepare_t5_attention_params(...);
    position_bias: (H, S, S)."""
    B, S, D = hidden_states.shape
    wq, wk, wv, wo = params['wq'], params['wk'], params['wv'], params['wo']
    H, _, dk = wq.shape
    inner = H * dk
    cdt = wq.dtype

    x = hidden_states.astype(cdt)
    bias = position_bias.astype(jnp.float32)

    vmem = pl.BlockSpec(memory_space=pltpu.MemorySpace.VMEM)
    out2d = pl.pallas_call(
        _t5_attention_kernel,
        out_shape=jax.ShapeDtypeStruct((B * S, D), hidden_states.dtype),
        in_specs=[vmem, vmem, vmem, vmem, vmem, vmem],
        out_specs=vmem,
        scratch_shapes=[pltpu.VMEM((B * S, inner), cdt)],
    )(x, wq, wk, wv, wo, bias)
    return out2d.reshape(B, S, D)                 # host-side reshape, free


# ----- plain-JAX glue: relative position bias (matches T5Attention.compute_bias) -----
def _relative_position_bucket(relative_position, bidirectional=True,
                              num_buckets=32, max_distance=128):
    relative_buckets = jnp.zeros_like(relative_position)
    if bidirectional:
        num_buckets //= 2
        relative_buckets = relative_buckets + (relative_position > 0).astype(jnp.int32) * num_buckets
        relative_position = jnp.abs(relative_position)
    else:
        relative_position = -jnp.minimum(relative_position, jnp.zeros_like(relative_position))
    max_exact = num_buckets // 2
    is_small = relative_position < max_exact
    rp_if_large = max_exact + (
        jnp.log(relative_position.astype(jnp.float32) / max_exact)
        / math.log(max_distance / max_exact) * (num_buckets - max_exact)
    ).astype(jnp.int32)
    rp_if_large = jnp.minimum(rp_if_large, num_buckets - 1)
    relative_buckets = relative_buckets + jnp.where(is_small, relative_position, rp_if_large)
    return relative_buckets


def compute_position_bias(query_length, key_length, rel_attn_bias_table):
    context_position = jnp.arange(query_length, dtype=jnp.int32)[:, None]
    memory_position = jnp.arange(key_length, dtype=jnp.int32)[None, :]
    relative_position = memory_position - context_position
    buckets = _relative_position_bucket(
        relative_position, bidirectional=not IS_DECODER,
        num_buckets=NUM_BUCKETS, max_distance=MAX_DISTANCE)
    values = jnp.take(rel_attn_bias_table, buckets, axis=0)   # (S, S, H)
    return jnp.transpose(values, (2, 0, 1))                   # (H, S, S)


# ----- pure-JAX reference for correctness -----
def t5_attention_ref(x, wq, wk, wv, wo, bias):
    B, S, D = x.shape
    q = (x @ wq).reshape(B, S, N_HEADS, D_KV).transpose(0, 2, 1, 3)
    k = (x @ wk).reshape(B, S, N_HEADS, D_KV).transpose(0, 2, 1, 3)
    v = (x @ wv).reshape(B, S, N_HEADS, D_KV).transpose(0, 2, 1, 3)
    scores = jnp.einsum("bhqd,bhkd->bhqk", q, k) + bias[None]
    attn = jax.nn.softmax(scores.astype(jnp.float32), axis=-1)
    ctx = jnp.einsum("bhqk,bhkd->bhqd", attn, v)
    ctx = ctx.transpose(0, 2, 1, 3).reshape(B, S, INNER)
    return ctx @ wo


if __name__ == "__main__":
    key = jax.random.PRNGKey(0)
    k0, k1, k2, k3, k4, k5 = jax.random.split(key, 6)

    x = jax.random.normal(k0, (BATCH, SEQ, D_MODEL), dtype=jnp.float32)
    wq = jax.random.normal(k1, (D_MODEL, INNER), dtype=jnp.float32) * 0.05
    wk = jax.random.normal(k2, (D_MODEL, INNER), dtype=jnp.float32) * 0.05
    wv = jax.random.normal(k3, (D_MODEL, INNER), dtype=jnp.float32) * 0.05
    wo = jax.random.normal(k4, (INNER, D_MODEL), dtype=jnp.float32) * 0.05
    rel_attn_bias_table = jax.random.normal(k5, (NUM_BUCKETS, N_HEADS), dtype=jnp.float32) * 0.1

    position_bias = compute_position_bias(SEQ, SEQ, rel_attn_bias_table)   # (H, S, S)

    # One-time param preparation (hoisted out of the forward wrapper).
    params = prepare_t5_attention_params(wq, wk, wv, wo, compute_dtype=jnp.float32)

    out = t5_attention(x, params, position_bias)
    out = jax.block_until_ready(out)

    ref = t5_attention_ref(x, wq, wk, wv, wo, position_bias)
    assert out.shape == (BATCH, SEQ, D_MODEL)
    assert jnp.allclose(out, ref, atol=1e-3, rtol=1e-3), "mismatch vs JAX reference"

    print("KERNEL_OK")
</pallas_src>

<mosaic_0001>
module attributes {stable_mosaic.version = 11 : i64} {
  func.func @_t5_attention_kernel(%arg0: memref<2x8x32xf32, #tpu.memory_space<vmem>>, %arg1: memref<4x32x8xf32, #tpu.memory_space<vmem>>, %arg2: memref<4x32x8xf32, #tpu.memory_space<vmem>>, %arg3: memref<4x32x8xf32, #tpu.memory_space<vmem>>, %arg4: memref<32x32xf32, #tpu.memory_space<vmem>>, %arg5: memref<4x8x8xf32, #tpu.memory_space<vmem>>, %arg6: memref<16x32xf32, #tpu.memory_space<vmem>>, %arg7: memref<16x32xf32, #tpu.memory_space<vmem>>) attributes {dimension_semantics = [], scalar_prefetch = 0 : i64, scratch_operands = 1 : i64, tpu.core_type = #tpu.core_type<tc>} {
    %c0 = arith.constant 0 : index
    %c0_0 = arith.constant 0 : index
    %c0_1 = arith.constant 0 : index
    %0 = vector.load %arg0[%c0, %c0_0, %c0_1] : memref<2x8x32xf32, #tpu.memory_space<vmem>>, vector<2x8x32xf32>
    %1 = vector.shape_cast %0 : vector<2x8x32xf32> to vector<2x1x8x32xf32>
    %2 = vector.shape_cast %1 : vector<2x1x8x32xf32> to vector<2x1x8x32xf32>
    %3 = vector.broadcast %2 : vector<2x1x8x32xf32> to vector<2x4x8x32xf32>
    %4 = vector.shape_cast %3 : vector<2x4x8x32xf32> to vector<8x8x32xf32>
    %c0_2 = arith.constant 0 : index
    %c0_3 = arith.constant 0 : index
    %c0_4 = arith.constant 0 : index
    %5 = vector.load %arg1[%c0_2, %c0_3, %c0_4] : memref<4x32x8xf32, #tpu.memory_space<vmem>>, vector<4x32x8xf32>
    %6 = vector.shape_cast %5 : vector<4x32x8xf32> to vector<1x4x32x8xf32>
    %7 = vector.shape_cast %6 : vector<1x4x32x8xf32> to vector<1x4x32x8xf32>
    %8 = vector.broadcast %7 : vector<1x4x32x8xf32> to vector<2x4x32x8xf32>
    %9 = vector.shape_cast %8 : vector<2x4x32x8xf32> to vector<8x32x8xf32>
    "tpu.trace_start"() <{level = 10 : i32, message = "nsd,ndk->nsk"}> : () -> ()
    %cst = arith.constant dense<0.000000e+00> : vector<8x8x8xf32>
    %10 = tpu.matmul %4, %9, %cst {dimension_numbers = #tpu.dot_dimension_numbers<[2], [1], [1], [2], [0, 0, 0, 1, 1, 2], [0], [0]>} : vector<8x8x32xf32>, vector<8x32x8xf32>, vector<8x8x8xf32> -> vector<8x8x8xf32>
    "tpu.trace_stop"() : () -> ()
    %c0_5 = arith.constant 0 : index
    %c0_6 = arith.constant 0 : index
    %c0_7 = arith.constant 0 : index
    %11 = vector.load %arg2[%c0_5, %c0_6, %c0_7] : memref<4x32x8xf32, #tpu.memory_space<vmem>>, vector<4x32x8xf32>
    %12 = vector.shape_cast %11 : vector<4x32x8xf32> to vector<1x4x32x8xf32>
    %13 = vector.shape_cast %12 : vector<1x4x32x8xf32> to vector<1x4x32x8xf32>
    %14 = vector.broadcast %13 : vector<1x4x32x8xf32> to vector<2x4x32x8xf32>
    %15 = vector.shape_cast %14 : vector<2x4x32x8xf32> to vector<8x32x8xf32>
    "tpu.trace_start"() <{level = 10 : i32, message = "nsd,ndk->nsk"}> : () -> ()
    %cst_8 = arith.constant dense<0.000000e+00> : vector<8x8x8xf32>
    %16 = tpu.matmul %4, %15, %cst_8 {dimension_numbers = #tpu.dot_dimension_numbers<[2], [1], [1], [2], [0, 0, 0, 1, 1, 2], [0], [0]>} : vector<8x8x32xf32>, vector<8x32x8xf32>, vector<8x8x8xf32> -> vector<8x8x8xf32>
    "tpu.trace_stop"() : () -> ()
    %c0_9 = arith.constant 0 : index
    %c0_10 = arith.constant 0 : index
    %c0_11 = arith.constant 0 : index
    %17 = vector.load %arg3[%c0_9, %c0_10, %c0_11] : memref<4x32x8xf32, #tpu.memory_space<vmem>>, vector<4x32x8xf32>
    %18 = vector.shape_cast %17 : vector<4x32x8xf32> to vector<1x4x32x8xf32>
    %19 = vector.shape_cast %18 : vector<1x4x32x8xf32> to vector<1x4x32x8xf32>
    %20 = vector.broadcast %19 : vector<1x4x32x8xf32> to vector<2x4x32x8xf32>
    %21 = vector.shape_cast %20 : vector<2x4x32x8xf32> to vector<8x32x8xf32>
    "tpu.trace_start"() <{level = 10 : i32, message = "nsd,ndk->nsk"}> : () -> ()
    %cst_12 = arith.constant dense<0.000000e+00> : vector<8x8x8xf32>
    %22 = tpu.matmul %4, %21, %cst_12 {dimension_numbers = #tpu.dot_dimension_numbers<[2], [1], [1], [2], [0, 0, 0, 1, 1, 2], [0], [0]>} : vector<8x8x32xf32>, vector<8x32x8xf32>, vector<8x8x8xf32> -> vector<8x8x8xf32>
    "tpu.trace_stop"() : () -> ()
    "tpu.trace_start"() <{level = 10 : i32, message = "nqd,nkd->nqk"}> : () -> ()
    %cst_13 = arith.constant dense<0.000000e+00> : vector<8x8x8xf32>
    %23 = tpu.matmul %10, %16, %cst_13 {dimension_numbers = #tpu.dot_dimension_numbers<[2], [2], [1], [1], [0, 0, 0, 1, 1, 1], [0], [0]>} : vector<8x8x8xf32>, vector<8x8x8xf32>, vector<8x8x8xf32> -> vector<8x8x8xf32>
    "tpu.trace_stop"() : () -> ()
    %c0_14 = arith.constant 0 : index
    %c0_15 = arith.constant 0 : index
    %c0_16 = arith.constant 0 : index
    %24 = vector.load %arg5[%c0_14, %c0_15, %c0_16] : memref<4x8x8xf32, #tpu.memory_space<vmem>>, vector<4x8x8xf32>
    %25 = vector.shape_cast %24 : vector<4x8x8xf32> to vector<1x4x8x8xf32>
    %26 = vector.shape_cast %25 : vector<1x4x8x8xf32> to vector<1x4x8x8xf32>
    %27 = vector.broadcast %26 : vector<1x4x8x8xf32> to vector<2x4x8x8xf32>
    %28 = vector.shape_cast %27 : vector<2x4x8x8xf32> to vector<8x8x8xf32>
    %29 = arith.addf %23, %28 : vector<8x8x8xf32>
    %cst_17 = arith.constant dense<0xFF800000> : vector<8x8xf32>
    %30 = vector.multi_reduction <maximumf>, %29, %cst_17 [2] : vector<8x8x8xf32> to vector<8x8xf32>
    %31 = vector.shape_cast %30 : vector<8x8xf32> to vector<8x8x1xf32>
    %32 = vector.broadcast %31 : vector<8x8x1xf32> to vector<8x8x8xf32>
    %33 = arith.subf %29, %32 : vector<8x8x8xf32>
    %34 = math.exp %33 : vector<8x8x8xf32>
    %cst_18 = arith.constant dense<0.000000e+00> : vector<8x8xf32>
    %35 = vector.multi_reduction <add>, %34, %cst_18 [2] : vector<8x8x8xf32> to vector<8x8xf32>
    %36 = vector.shape_cast %35 : vector<8x8xf32> to vector<8x8x1xf32>
    %37 = vector.broadcast %36 : vector<8x8x1xf32> to vector<8x8x8xf32>
    %38 = arith.divf %34, %37 : vector<8x8x8xf32>
    "tpu.trace_start"() <{level = 10 : i32, message = "nqk,nkd->nqd"}> : () -> ()
    %cst_19 = arith.constant dense<0.000000e+00> : vector<8x8x8xf32>
    %39 = tpu.matmul %38, %22, %cst_19 {dimension_numbers = #tpu.dot_dimension_numbers<[2], [1], [1], [2], [0, 0, 0, 1, 1, 2], [0], [0]>} : vector<8x8x8xf32>, vector<8x8x8xf32>, vector<8x8x8xf32> -> vector<8x8x8xf32>
    "tpu.trace_stop"() : () -> ()
    %40 = vector.extract_strided_slice %39 {offsets = [0, 0, 0], sizes = [1, 8, 8], strides = [1, 1, 1]} : vector<8x8x8xf32> to vector<1x8x8xf32>
    %41 = vector.shape_cast %40 : vector<1x8x8xf32> to vector<8x8xf32>
    %c0_20 = arith.constant 0 : index
    %c0_21 = arith.constant 0 : index
    %42 = vector.load %arg7[%c0_20, %c0_21] : memref<16x32xf32, #tpu.memory_space<vmem>>, vector<8x8xf32>
    tpu.vector_store %arg7[%c0_20, %c0_21], %41 {strides = array<i32>} : memref<16x32xf32, #tpu.memory_space<vmem>>, vector<8x8xf32>,
    %43 = vector.extract_strided_slice %39 {offsets = [1, 0, 0], sizes = [1, 8, 8], strides = [1, 1, 1]} : vector<8x8x8xf32> to vector<1x8x8xf32>
    %44 = vector.shape_cast %43 : vector<1x8x8xf32> to vector<8x8xf32>
    %c0_22 = arith.constant 0 : index
    %c8 = arith.constant 8 : index
    %45 = vector.load %arg7[%c0_22, %c8] : memref<16x32xf32, #tpu.memory_space<vmem>>, vector<8x8xf32>
    tpu.vector_store %arg7[%c0_22, %c8], %44 {strides = array<i32>} : memref<16x32xf32, #tpu.memory_space<vmem>>, vector<8x8xf32>,
    %46 = vector.extract_strided_slice %39 {offsets = [2, 0, 0], sizes = [1, 8, 8], strides = [1, 1, 1]} : vector<8x8x8xf32> to vector<1x8x8xf32>
    %47 = vector.shape_cast %46 : vector<1x8x8xf32> to vector<8x8xf32>
    %c0_23 = arith.constant 0 : index
    %c16 = arith.constant 16 : index
    %48 = vector.load %arg7[%c0_23, %c16] : memref<16x32xf32, #tpu.memory_space<vmem>>, vector<8x8xf32>
    tpu.vector_store %arg7[%c0_23, %c16], %47 {strides = array<i32>} : memref<16x32xf32, #tpu.memory_space<vmem>>, vector<8x8xf32>,
    %49 = vector.extract_strided_slice %39 {offsets = [3, 0, 0], sizes = [1, 8, 8], strides = [1, 1, 1]} : vector<8x8x8xf32> to vector<1x8x8xf32>
    %50 = vector.shape_cast %49 : vector<1x8x8xf32> to vector<8x8xf32>
    %c0_24 = arith.constant 0 : index
    %c24 = arith.constant 24 : index
    %51 = vector.load %arg7[%c0_24, %c24] : memref<16x32xf32, #tpu.memory_space<vmem>>, vector<8x8xf32>
    tpu.vector_store %arg7[%c0_24, %c24], %50 {strides = array<i32>} : memref<16x32xf32, #tpu.memory_space<vmem>>, vector<8x8xf32>,
    %52 = vector.extract_strided_slice %39 {offsets = [4, 0, 0], sizes = [1, 8, 8], strides = [1, 1, 1]} : vector<8x8x8xf32> to vector<1x8x8xf32>
    %53 = vector.shape_cast %52 : vector<1x8x8xf32> to vector<8x8xf32>
    %c8_25 = arith.constant 8 : index
    %c0_26 = arith.constant 0 : index
    %54 = vector.load %arg7[%c8_25, %c0_26] : memref<16x32xf32, #tpu.memory_space<vmem>>, vector<8x8xf32>
    tpu.vector_store %arg7[%c8_25, %c0_26], %53 {strides = array<i32>} : memref<16x32xf32, #tpu.memory_space<vmem>>, vector<8x8xf32>,
    %55 = vector.extract_strided_slice %39 {offsets = [5, 0, 0], sizes = [1, 8, 8], strides = [1, 1, 1]} : vector<8x8x8xf32> to vector<1x8x8xf32>
    %56 = vector.shape_cast %55 : vector<1x8x8xf32> to vector<8x8xf32>
    %c8_27 = arith.constant 8 : index
    %c8_28 = arith.constant 8 : index
    %57 = vector.load %arg7[%c8_27, %c8_28] : memref<16x32xf32, #tpu.memory_space<vmem>>, vector<8x8xf32>
    tpu.vector_store %arg7[%c8_27, %c8_28], %56 {strides = array<i32>} : memref<16x32xf32, #tpu.memory_space<vmem>>, vector<8x8xf32>,
    %58 = vector.extract_strided_slice %39 {offsets = [6, 0, 0], sizes = [1, 8, 8], strides = [1, 1, 1]} : vector<8x8x8xf32> to vector<1x8x8xf32>
    %59 = vector.shape_cast %58 : vector<1x8x8xf32> to vector<8x8xf32>
    %c8_29 = arith.constant 8 : index
    %c16_30 = arith.constant 16 : index
    %60 = vector.load %arg7[%c8_29, %c16_30] : memref<16x32xf32, #tpu.memory_space<vmem>>, vector<8x8xf32>
    tpu.vector_store %arg7[%c8_29, %c16_30], %59 {strides = array<i32>} : memref<16x32xf32, #tpu.memory_space<vmem>>, vector<8x8xf32>,
    %61 = vector.extract_strided_slice %39 {offsets = [7, 0, 0], sizes = [1, 8, 8], strides = [1, 1, 1]} : vector<8x8x8xf32> to vector<1x8x8xf32>
    %62 = vector.shape_cast %61 : vector<1x8x8xf32> to vector<8x8xf32>
    %c8_31 = arith.constant 8 : index
    %c24_32 = arith.constant 24 : index
    %63 = vector.load %arg7[%c8_31, %c24_32] : memref<16x32xf32, #tpu.memory_space<vmem>>, vector<8x8xf32>
    tpu.vector_store %arg7[%c8_31, %c24_32], %62 {strides = array<i32>} : memref<16x32xf32, #tpu.memory_space<vmem>>, vector<8x8xf32>,
    %c0_33 = arith.constant 0 : index
    %c0_34 = arith.constant 0 : index
    %64 = vector.load %arg7[%c0_33, %c0_34] : memref<16x32xf32, #tpu.memory_space<vmem>>, vector<16x32xf32>
    %c0_35 = arith.constant 0 : index
    %c0_36 = arith.constant 0 : index
    %65 = vector.load %arg4[%c0_35, %c0_36] : memref<32x32xf32, #tpu.memory_space<vmem>>, vector<32x32xf32>
    %cst_37 = arith.constant dense<0.000000e+00> : vector<16x32xf32>
    %66 = tpu.matmul %64, %65, %cst_37 {dimension_numbers = #tpu.dot_dimension_numbers<[1], [0], [0], [1], [0, 0, 1, 1], [], []>} : vector<16x32xf32>, vector<32x32xf32>, vector<16x32xf32> -> vector<16x32xf32>
    %c0_38 = arith.constant 0 : index
    %c0_39 = arith.constant 0 : index
    %67 = vector.load %arg6[%c0_38, %c0_39] : memref<16x32xf32, #tpu.memory_space<vmem>>, vector<16x32xf32>
    tpu.vector_store %arg6[%c0_38, %c0_39], %66 {strides = array<i32>} : memref<16x32xf32, #tpu.memory_space<vmem>>, vector<16x32xf32>,
    return
  }
}

</mosaic_0001>

<bundles_post_ra>
// kernel: tpu_custom_call.1
= control target key start
LH: loop header
LB: loop body
LE: loop exit
PB: predicated region body
PF: predicated region fallthrough
CT: control target
= control target key end

     0   :  { %vm42_vm0 = vcmask 261120   ;;  %s1754_s0 = inlined_call_operand.vmem [shape: f32[2,8,32], index: 0, kind: input, shape index: {}]   ;;  %s1755_s1 = inlined_call_operand.vmem [shape: f32[4,32,8], index: 1, kind: input, shape index: {}]   ;;  %s1756_s2 = inlined_call_operand.vmem [shape: f32[4,32,8], index: 2, kind: input, shape index: {}]   ;;  %s1757_s3 = inlined_call_operand.vmem [shape: f32[4,32,8], index: 3, kind: input, shape index: {}]   ;;  %s1758_s4 = inlined_call_operand.vmem [shape: f32[32,32], index: 4, kind: input, shape index: {}]   ;;  %s1759_s5 = inlined_call_operand.vmem [shape: f32[4,8,8], index: 5, kind: input, shape index: {}]   ;;  %s1760_s6 = inlined_call_operand.hbm [shape: f32[16,32], index: 6, kind: output, shape index: {}]  }
   0x1   :  { %v29_v0 = vld [vmem:[%s1755_s1 + $0x18] sm:$0xff]  ;;  %v28_v3 = vld [vmem:[%s1755_s1 + $0x10] sm:$0xff]  ;;  %v27_v6 = vld [vmem:[%s1755_s1 + $0x8] sm:$0xff] }
   0x2   :  { %v37_v1 = vld [vmem:[%s1755_s1 + $0x58] sm:$0xff]  ;;  %58 = vmatpush.msra.mxu1 %v29_v0  ;;  %v36_v4 = vld [vmem:[%s1755_s1 + $0x50] sm:$0xff]  ;;  %141 = vmatpush.msra.mxu0 %v29_v0  ;;  %v35_v7 = vld [vmem:[%s1755_s1 + $0x48] sm:$0xff] }
   0x3   :  { %v41_v2 = vld [vmem:[%s1755_s1 + $0x78] sm:$0xff]  ;;  %98 = vmatpush.msra.mxu2 %v37_v1  ;;  %v40_v5 = vld [vmem:[%s1755_s1 + $0x70] sm:$0xff]  ;;  %v39_v8 = vld [vmem:[%s1755_s1 + $0x68] sm:$0xff] }
   0x4   :  { %118 = vmatpush.msra.mxu3 %v41_v2  ;;  %59 = vmatpush.msra.mxu1 %v28_v3  ;;  %v26_v9 = vld [vmem:[%s1755_s1] sm:$0xff]  ;;  %v1437_v13 = vld [vmem:[%s1754_s0 + $0x8] sm:$0xff]  ;;  %v33_v14 = vld [vmem:[%s1755_s1 + $0x38] sm:$0xff] }
   0x5   :  { %99 = vmatpush.msra.mxu2 %v36_v4  ;;  %142 = vmatpush.msra.mxu0 %v28_v3  ;;  %v34_v10 = vld [vmem:[%s1755_s1 + $0x40] sm:$0xff]  ;;  %v212_v15 = vld [vmem:[%s1756_s2 + $0x18] sm:$0xff]  ;;  %v32_v16 = vld [vmem:[%s1755_s1 + $0x30] sm:$0xff] }
   0x6   :  { %119 = vmatpush.msra.mxu3 %v40_v5  ;;  %60 = vmatpush.msra.mxu1 %v27_v6  ;;  %v38_v11 = vld [vmem:[%s1755_s1 + $0x60] sm:$0xff]  ;;  %v211_v17 = vld [vmem:[%s1756_s2 + $0x10] sm:$0xff] }
   0x7   :  { %100 = vmatpush.msra.mxu2 %v35_v7  ;;  %143 = vmatpush.msra.mxu0 %v27_v6  ;;  %v1432_v12 = vld [vmem:[%s1754_s0] sm:$0xff] }
   0x8   :  { %120 = vmatpush.msra.mxu3 %v39_v8  ;;  %61 = vmatpush.msra.mxu1 %v26_v9 }
   0x9   :  { %101 = vmatpush.msra.mxu2 %v34_v10  ;;  %144 = vmatpush.msra.mxu0 %v26_v9 }
   0xa   :  { %121 = vmatpush.msra.mxu3 %v38_v11  ;;  %1240 = vmatmul.msk.f32.vlgmr.msra.gmra.mxu1 %vm42_vm0, %v1432_v12 }
   0xb   :  { %1242 = vmatmul.msk.f32.vlgmr.msra.gmra.mxu2 %vm42_vm0, %v1432_v12  ;;  %1243 = vmatmul.msk.f32.vlgmr.msra.gmra.mxu3 %vm42_vm0, %v1432_v12 }
   0xc   :  { %1244 = vmatmul.msk.f32.vlgmr.msra.gmra.mxu0 %vm42_vm0, %v1437_v13  ;;  %78 = vmatpush.msrb.mxu1 %v33_v14 }
   0xd   :  { %181 = vmatpush.msrb.mxu2 %v37_v1 }
   0xe   :  { %11 = vsyncpa [#allocation4], 0  ;;  %201 = vmatpush.msrb.mxu3 %v41_v2  ;;  %237 = vmatpush.msrb.mxu0 %v212_v15  ;;  %v31_v18 = vld [vmem:[%s1755_s1 + $0x28] sm:$0xff]  ;;  %v30_v20 = vld [vmem:[%s1755_s1 + $0x20] sm:$0xff]  ;;  %vm565_vm1 = vcmask 64512   ;;  %s1354_s24 = smov 16  }
   0xf   :  { %79 = vmatpush.msrb.mxu1 %v32_v16  ;;  %182 = vmatpush.msrb.mxu2 %v36_v4  ;;  %v210_v19 = vld [vmem:[%s1756_s2 + $0x8] sm:$0xff]  ;;  %v209_v21 = vld [vmem:[%s1756_s2] sm:$0xff]  ;;  %v220_v22 = vld [vmem:[%s1756_s2 + $0x58] sm:$0xff]  ;;  %s1355_s25 = smov 24   ;;  %s1228_s10 = sshll.u32 %s1760_s6, 4  ;;  %s1229_s10 = int_to_ptr.hbm [resolvable:$true] %s1228_s10 }
  0x10   :  { %202 = vmatpush.msrb.mxu3 %v40_v5  ;;  %238 = vmatpush.msrb.mxu0 %v211_v17  ;;  %v224_v23 = vld [vmem:[%s1756_s2 + $0x78] sm:$0xff]  ;;  %v219_v24 = vld [vmem:[%s1756_s2 + $0x50] sm:$0xff]  ;;  %v218_v26 = vld [vmem:[%s1756_s2 + $0x48] sm:$0xff]  ;;  %s1356_s11 = smov [#allocation3]   ;;  %s1357_s13 = smov 128  }
  0x11   :  { %80 = vmatpush.msrb.mxu1 %v31_v18  ;;  %183 = vmatpush.msrb.mxu2 %v35_v7  ;;  %v223_v25 = vld [vmem:[%s1756_s2 + $0x70] sm:$0xff]  ;;  %v222_v27 = vld [vmem:[%s1756_s2 + $0x68] sm:$0xff]  ;;  %v217_v28 = vld [vmem:[%s1756_s2 + $0x40] sm:$0xff]  ;;  %s1226_s12 = sshll.u32 %s1356_s11, 4  ;;  %s1227_s12 = int_to_ptr.vmem [resolvable:$true] %s1226_s12 }
  0x12   :  { %203 = vmatpush.msrb.mxu3 %v39_v8  ;;  %239 = vmatpush.msrb.mxu0 %v210_v19  ;;  %v221_v29 = vld [vmem:[%s1756_s2 + $0x60] sm:$0xff]  ;;  %v216_v30 = vld [vmem:[%s1756_s2 + $0x38] sm:$0xff]  ;;  %v215_v31 = vld [vmem:[%s1756_s2 + $0x30] sm:$0xff] }
  0x13   :  { %81 = vmatpush.msrb.mxu1 %v30_v20  ;;  %184 = vmatpush.msrb.mxu2 %v34_v10  ;;  %v214_v32 = vld [vmem:[%s1756_s2 + $0x28] sm:$0xff]  ;;  %v388_v33 = vld [vmem:[%s1757_s3 + $0x18] sm:$0xff]  ;;  %v213_v34 = vld [vmem:[%s1756_s2 + $0x20] sm:$0xff] }
  0x14   :  { %204 = vmatpush.msrb.mxu3 %v38_v11  ;;  %240 = vmatpush.msrb.mxu0 %v209_v21  ;;  %v387_v35 = vld [vmem:[%s1757_s3 + $0x10] sm:$0xff]  ;;  %v386_v36 = vld [vmem:[%s1757_s3 + $0x8] sm:$0xff]  ;;  %v385_v37 = vld [vmem:[%s1757_s3] sm:$0xff] }
  0x15   :  { %1241 = vmatmul.msk.f32.vlgmr.msrb.gmra.mxu1 %vm42_vm0, %v1432_v12  ;;  %1246 = vmatmul.msk.f32.vlgmr.msrb.gmra.mxu2 %vm42_vm0, %v1437_v13  ;;  %v396_v38 = vld [vmem:[%s1757_s3 + $0x58] sm:$0xff]  ;;  %v395_v41 = vld [vmem:[%s1757_s3 + $0x50] sm:$0xff]  ;;  %v394_v44 = vld [vmem:[%s1757_s3 + $0x48] sm:$0xff] }
  0x16   :  { %1247 = vmatmul.msk.f32.vlgmr.msrb.gmra.mxu3 %vm42_vm0, %v1437_v13  ;;  %1248 = vmatmul.msk.f32.vlgmr.msrb.gmra.mxu0 %vm42_vm0, %v1432_v12  ;;  %v400_v39 = vld [vmem:[%s1757_s3 + $0x78] sm:$0xff]  ;;  %v399_v42 = vld [vmem:[%s1757_s3 + $0x70] sm:$0xff]  ;;  %v398_v45 = vld [vmem:[%s1757_s3 + $0x68] sm:$0xff] }
  0x17   :  { %161 = vmatpush.msra.mxu1 %v33_v14  ;;  %277 = vmatpush.msra.mxu2 %v220_v22  ;;  %v392_v40 = vld [vmem:[%s1757_s3 + $0x38] sm:$0xff]  ;;  %v391_v43 = vld [vmem:[%s1757_s3 + $0x30] sm:$0xff]  ;;  %v390_v46 = vld [vmem:[%s1757_s3 + $0x28] sm:$0xff] }
  0x18   :  { %297 = vmatpush.msra.mxu3 %v224_v23  ;;  %317 = vmatpush.msra.mxu0 %v212_v15  ;;  %v393_v47 = vld [vmem:[%s1757_s3 + $0x40] sm:$0xff]  ;;  %v562_v10 = vld [vmem:[%s1759_s5 + $0x8] sm:$0xff] }
  0x19   :  { %162 = vmatpush.msra.mxu1 %v32_v16  ;;  %278 = vmatpush.msra.mxu2 %v219_v24  ;;  %v397_v48 = vld [vmem:[%s1757_s3 + $0x60] sm:$0xff] }
  0x1a   :  { %298 = vmatpush.msra.mxu3 %v223_v25  ;;  %318 = vmatpush.msra.mxu0 %v211_v17  ;;  %v389_v49 = vld [vmem:[%s1757_s3 + $0x20] sm:$0xff] }
  0x1b   :  { %163 = vmatpush.msra.mxu1 %v31_v18  ;;  %279 = vmatpush.msra.mxu2 %v218_v26 }
  0x1c   :  { %299 = vmatpush.msra.mxu3 %v222_v27  ;;  %319 = vmatpush.msra.mxu0 %v210_v19 }
  0x1d   :  { %164 = vmatpush.msra.mxu1 %v30_v20  ;;  %280 = vmatpush.msra.mxu2 %v217_v28  ;;  %v564_v20 = vld [vmem:[%s1759_s5 + $0x18] sm:$0xff] }
  0x1e   :  { %300 = vmatpush.msra.mxu3 %v221_v29  ;;  %1245 = vmatmul.msk.f32.vlgmr.msra.gmra.mxu1 %vm42_vm0, %v1437_v13 }
  0x1f   :  { %1250 = vmatmul.msk.f32.vlgmr.msra.gmra.mxu2 %vm42_vm0, %v1432_v12  ;;  %1251 = vmatmul.msk.f32.vlgmr.msra.gmra.mxu3 %vm42_vm0, %v1432_v12 }
  0x20   :  { %257 = vmatpush.msrb.mxu1 %v216_v30  ;;  %357 = vmatpush.msrb.mxu2 %v220_v22 }
  0x21   :  { %377 = vmatpush.msrb.mxu3 %v224_v23  ;;  %320 = vmatpush.msra.mxu0 %v209_v21 }
  0x22   :  { %258 = vmatpush.msrb.mxu1 %v215_v31  ;;  %358 = vmatpush.msrb.mxu2 %v219_v24 }
  0x23   :  { %378 = vmatpush.msrb.mxu3 %v223_v25  ;;  %1252 = vmatmul.msk.f32.vlgmr.msra.gmra.mxu0 %vm42_vm0, %v1437_v13 }
  0x24   :  { %259 = vmatpush.msrb.mxu1 %v214_v32  ;;  %359 = vmatpush.msrb.mxu2 %v218_v26 }
  0x25   :  { %379 = vmatpush.msrb.mxu3 %v222_v27  ;;  %413 = vmatpush.msrb.mxu0 %v388_v33 }
  0x26   :  { %260 = vmatpush.msrb.mxu1 %v213_v34  ;;  %360 = vmatpush.msrb.mxu2 %v217_v28  ;;  %v561_v28 = vld [vmem:[%s1759_s5] sm:$0xff] }
  0x27   :  { %380 = vmatpush.msrb.mxu3 %v221_v29  ;;  %1249 = vmatmul.msk.f32.vlgmr.msrb.gmra.mxu1 %vm42_vm0, %v1432_v12 }
  0x28   :  { %1254 = vmatmul.msk.f32.vlgmr.msrb.gmra.mxu2 %vm42_vm0, %v1437_v13  ;;  %1255 = vmatmul.msk.f32.vlgmr.msrb.gmra.mxu3 %vm42_vm0, %v1437_v13 }
  0x29   :  { %337 = vmatpush.msra.mxu1 %v216_v30  ;;  %414 = vmatpush.msrb.mxu0 %v387_v35 }
  0x2a   :  { %453 = vmatpush.msra.mxu2 %v396_v38  ;;  %473 = vmatpush.msra.mxu3 %v400_v39 }
  0x2b   :  { %338 = vmatpush.msra.mxu1 %v215_v31  ;;  %415 = vmatpush.msrb.mxu0 %v386_v36 }
  0x2c   :  { %454 = vmatpush.msra.mxu2 %v395_v41  ;;  %474 = vmatpush.msra.mxu3 %v399_v42 }
  0x2d   :  { %339 = vmatpush.msra.mxu1 %v214_v32  ;;  %416 = vmatpush.msrb.mxu0 %v385_v37 }
  0x2e   :  { %1256 = vmatmul.msk.f32.vlgmr.msrb.gmra.mxu0 %vm42_vm0, %v1432_v12  ;;  %455 = vmatpush.msra.mxu2 %v394_v44 }
  0x2f   :  { %340 = vmatpush.msra.mxu1 %v213_v34  ;;  %493 = vmatpush.msra.mxu0 %v388_v33 }
  0x30   :  { %1253 = vmatmul.msk.f32.vlgmr.msra.gmra.mxu1 %vm42_vm0, %v1437_v13  ;;  %475 = vmatpush.msra.mxu3 %v398_v45 }
  0x31   :  { %494 = vmatpush.msra.mxu0 %v387_v35  ;;  %433 = vmatpush.msrb.mxu1 %v392_v40 }
  0x32   :  { %456 = vmatpush.msra.mxu2 %v393_v47  ;;  %476 = vmatpush.msra.mxu3 %v397_v48 }
  0x33   :  { %495 = vmatpush.msra.mxu0 %v386_v36  ;;  %434 = vmatpush.msrb.mxu1 %v391_v43 }
  0x34   :  { %1258 = vmatmul.msk.f32.vlgmr.msra.gmra.mxu2 %vm42_vm0, %v1432_v12  ;;  %1259 = vmatmul.msk.f32.vlgmr.msra.gmra.mxu3 %vm42_vm0, %v1432_v12 }
  0x35   :  { %496 = vmatpush.msra.mxu0 %v385_v37  ;;  %435 = vmatpush.msrb.mxu1 %v390_v46 }
  0x36   :  { %1260 = vmatmul.msk.f32.vlgmr.msra.gmra.mxu0 %vm42_vm0, %v1437_v13  ;;  %533 = vmatpush.msrb.mxu2 %v396_v38 }
  0x37   :  { %436 = vmatpush.msrb.mxu1 %v389_v49  ;;  %553 = vmatpush.msrb.mxu3 %v400_v39 }
  0x38   :  { %1257 = vmatmul.msk.f32.vlgmr.msrb.gmra.mxu1 %vm42_vm0, %v1432_v12  ;;  %534 = vmatpush.msrb.mxu2 %v395_v41 }
  0x39   :  { %513 = vmatpush.msra.mxu1 %v392_v40  ;;  %554 = vmatpush.msrb.mxu3 %v399_v42 }
  0x3a   :  { %535 = vmatpush.msrb.mxu2 %v394_v44 }
  0x3b   :  { %514 = vmatpush.msra.mxu1 %v391_v43  ;;  %555 = vmatpush.msrb.mxu3 %v398_v45 }
  0x3c   :  { %536 = vmatpush.msrb.mxu2 %v393_v47 }
  0x3d   :  { %515 = vmatpush.msra.mxu1 %v390_v46  ;;  %556 = vmatpush.msrb.mxu3 %v397_v48 }
  0x3e   :  { %1262 = vmatmul.msk.f32.vlgmr.msrb.gmra.mxu2 %vm42_vm0, %v1437_v13  ;;  %1263 = vmatmul.msk.f32.vlgmr.msrb.gmra.mxu3 %vm42_vm0, %v1437_v13 }
  0x3f   :  { %516 = vmatpush.msra.mxu1 %v389_v49 }
  0x40   :  { %1261 = vmatmul.msk.f32.vlgmr.msra.gmra.mxu1 %vm42_vm0, %v1437_v13  ;;  %v563_v13 = vld [vmem:[%s1759_s5 + $0x10] sm:$0xff]  ;;  %s1353_s5 = smov 8  }
  0x87   :  { %v63_v50 = vpop.f32.mrf.mxu1 }
  0x89   :  { %v146_v51 = vpop.f32.mrf.mxu0 }
  0x8e   :  { %v103_v52 = vpop.f32.mrf.mxu2  ;;  %v123_v53 = vpop.f32.mrf.mxu3 }
  0x92   :  { %v83_v54 = vpop.f32.mrf.mxu1 }
  0x93   :  { %v242_v55 = vpop.f32.mrf.mxu0 }
  0x94   :  { %1264 = vmatpush.xpose.msk.msrb.mxu0 %vm565_vm1, %v242_v55 }
  0x97   :  { %1265 = vmatmul.msk.f32.vlgmr.msrb.gmra.mxu0 %vm565_vm1, %v63_v50 }
  0x98   :  { %v186_v56 = vpop.f32.mrf.mxu2 }
  0x99   :  { %v206_v57 = vpop.f32.mrf.mxu3 }
  0x9b   :  { %v166_v58 = vpop.f32.mrf.mxu1 }
  0xa0   :  { %v322_v59 = vpop.f32.mrf.mxu0 }
  0xa1   :  { %1272 = vmatpush.xpose.msk.msra.mxu0 %vm565_vm1, %v322_v59 }
  0xa2   :  { %v282_v60 = vpop.f32.mrf.mxu2  ;;  %v302_v61 = vpop.f32.mrf.mxu3 }
  0xa3   :  { %1268 = vmatpush.xpose.msk.msra.mxu2 %vm565_vm1, %v282_v60  ;;  %1270 = vmatpush.xpose.msk.msra.mxu3 %vm565_vm1, %v302_v61 }
  0xa4   :  { %v262_v62 = vpop.f32.mrf.mxu1  ;;  %1273 = vmatmul.msk.f32.vlgmr.msra.gmra.mxu0 %vm565_vm1, %v146_v51 }
  0xa5   :  { %1266 = vmatpush.xpose.msk.msrb.mxu1 %vm565_vm1, %v262_v62 }
  0xa6   :  { %1269 = vmatmul.msk.f32.vlgmr.msra.gmra.mxu2 %vm565_vm1, %v103_v52  ;;  %1271 = vmatmul.msk.f32.vlgmr.msra.gmra.mxu3 %vm565_vm1, %v123_v53 }
  0xa8   :  { %1267 = vmatmul.msk.f32.vlgmr.msrb.gmra.mxu1 %vm565_vm1, %v83_v54 }
  0xab   :  { %v362_v63 = vpop.f32.mrf.mxu2  ;;  %v382_v0 = vpop.f32.mrf.mxu3 }
  0xac   :  { %1276 = vmatpush.xpose.msk.msrb.mxu2 %vm565_vm1, %v362_v63  ;;  %1278 = vmatpush.xpose.msk.msrb.mxu3 %vm565_vm1, %v382_v0  ;;  %v418_v1 = vpop.f32.mrf.mxu0 }
  0xad   :  { %v342_v2 = vpop.f32.mrf.mxu1  ;;  %984 = vmatpush.msrb.mxu0 %v418_v1 }
  0xae   :  { %1274 = vmatpush.xpose.msk.msra.mxu1 %vm565_vm1, %v342_v2 }
  0xaf   :  { %1277 = vmatmul.msk.f32.vlgmr.msrb.gmra.mxu2 %vm565_vm1, %v186_v56  ;;  %1279 = vmatmul.msk.f32.vlgmr.msrb.gmra.mxu3 %vm565_vm1, %v206_v57 }
  0xb1   :  { %1275 = vmatmul.msk.f32.vlgmr.msra.gmra.mxu1 %vm565_vm1, %v166_v58 }
  0xb4   :  { %v498_v3 = vpop.f32.mrf.mxu0 }
  0xb5   :  { %1076 = vmatpush.msra.mxu0 %v498_v3  ;;  %v438_v4 = vpop.f32.mrf.mxu1 }
  0xb6   :  { %1007 = vmatpush.msrb.mxu1 %v438_v4 }
  0xb7   :  { %v458_v5 = vpop.f32.mrf.mxu2  ;;  %v478_v6 = vpop.f32.mrf.mxu3 }
  0xb8   :  { %1030 = vmatpush.msra.mxu2 %v458_v5  ;;  %1053 = vmatpush.msra.mxu3 %v478_v6 }
  0xbd   :  { %v518_v7 = vpop.f32.mrf.mxu1 }
  0xbe   :  { %1099 = vmatpush.msra.mxu1 %v518_v7 }
  0xc1   :  { %v538_v8 = vpop.f32.mrf.mxu2  ;;  %v558_v9 = vpop.f32.mrf.mxu3 }
  0xc2   :  { %1122 = vmatpush.msrb.mxu2 %v538_v8  ;;  %1145 = vmatpush.msrb.mxu3 %v558_v9 }
 0x114   :  { %v589_v18 = vpop.f32.mrf.mxu0 }
 0x115   :  { %v590_v33 = vadd.f32 %v589_v18, %v561_v28 }
 0x117   :  { %v774_v36 = vsel %vm565_vm1, %v590_v33, -inf }
 0x121   :  { %v693_v27 = vpop.f32.mrf.mxu0 }
 0x122   :  { %v694_v32 = vadd.f32 %v693_v27, %v561_v28 }
 0x124   :  { %v786_v35 = vsel %vm565_vm1, %v694_v32, -inf }
 0x125   :  { %v615_v11 = vpop.f32.mrf.mxu1 }
 0x126   :  { %v616_v12 = vadd.f32 %v615_v11, %v562_v10 }
 0x128   :  { %v777_v14 = vsel %vm565_vm1, %v616_v12, -inf }
 0x129   :  { %v641_v15 = vpop.f32.mrf.mxu2  ;;  %v667_v16 = vpop.f32.mrf.mxu3  ;;  %778 = vmax.xlane.f32.xlu1 %v777_v14 }
 0x12a   :  { %v642_v17 = vadd.f32 %v641_v15, %v563_v13  ;;  %v668_v21 = vadd.f32 %v667_v16, %v564_v20 }
 0x12c   :  { %v780_v19 = vsel %vm565_vm1, %v642_v17, -inf  ;;  %v783_v26 = vsel %vm565_vm1, %v668_v21, -inf }
 0x12d   :  { %781 = vmax.xlane.f32.xlu0 %v780_v19 }
 0x12e   :  { %v719_v31 = vpop.f32.mrf.mxu1 }
 0x12f   :  { %v720_v34 = vadd.f32 %v719_v31, %v562_v10 }
 0x131   :  { %v789_v37 = vsel %vm565_vm1, %v720_v34, -inf }
 0x132   :  { %v745_v22 = vpop.f32.mrf.mxu2  ;;  %v771_v23 = vpop.f32.mrf.mxu3 }
 0x133   :  { %v746_v24 = vadd.f32 %v745_v22, %v563_v13  ;;  %v772_v25 = vadd.f32 %v771_v23, %v564_v20 }
 0x135   :  { %v795_v29 = vsel %vm565_vm1, %v772_v25, -inf  ;;  %784 = vmax.xlane.f32.xlu0 %v783_v26  ;;  %v792_v30 = vsel %vm565_vm1, %v746_v24, -inf }
 0x136   :  { %796 = vmax.xlane.f32.xlu2 %v795_v29  ;;  %793 = vmax.xlane.f32.xlu1 %v792_v30 }
 0x13d   :  { %775 = vmax.xlane.f32.xlu0 %v774_v36 }
 0x13e   :  { %790 = vmax.xlane.f32.xlu2 %v789_v37  ;;  %787 = vmax.xlane.f32.xlu1 %v786_v35 }
 0x19c   :  { %v779_v38 = vpop.xlane.xlu1 %778 }
 0x19d   :  { %v799_v39 = vsub.f32 %v616_v12, %v779_v38 }
 0x19f   :  { %v808_v40 = vmul.f32 1.442695, %v799_v39 }
 0x1a0   :  { %v782_v41 = vpop.xlane.xlu0 %781 }
 0x1a1   :  { %1295 = vpow2.f32 %v808_v40  ;;  %v800_v42 = vsub.f32 %v642_v17, %v782_v41 }
 0x1a3   :  { %v810_v43 = vmul.f32 1.442695, %v800_v42 }
 0x1a5   :  { %1297 = vpow2.f32 %v810_v43 }
 0x1a7   :  { %v1631_v44 = vpop.eup %1295 }
 0x1a8   :  { %v785_v45 = vpop.xlane.xlu0 %784  ;;  %v825_v46 = vsel %vm565_vm1, %v1631_v44, 0.0 }
 0x1a9   :  { %v797_v47 = vpop.xlane.xlu2 %796  ;;  %v801_v48 = vsub.f32 %v668_v21, %v785_v45  ;;  %v794_v49 = vpop.xlane.xlu1 %793  ;;  %826 = vadd.xlane.f32.xlu1 %v825_v46 }
 0x1aa   :  { %v804_v50 = vsub.f32 %v746_v24, %v794_v49  ;;  %v805_v52 = vsub.f32 %v772_v25, %v797_v47 }
 0x1ab   :  { %v1635_v51 = vpop.eup %1297  ;;  %v812_v53 = vmul.f32 1.442695, %v801_v48 }
 0x1ac   :  { %v818_v54 = vmul.f32 1.442695, %v804_v50  ;;  %v828_v55 = vsel %vm565_vm1, %v1635_v51, 0.0  ;;  %v820_v56 = vmul.f32 1.442695, %v805_v52 }
 0x1ad   :  { %1299 = vpow2.f32 %v812_v53  ;;  %829 = vadd.xlane.f32.xlu2 %v828_v55 }
 0x1ae   :  { %1301 = vpow2.f32 %v818_v54 }
 0x1af   :  { %1303 = vpow2.f32 %v820_v56 }
 0x1b0   :  { %v776_v57 = vpop.xlane.xlu0 %775 }
 0x1b1   :  { %v798_v58 = vsub.f32 %v590_v33, %v776_v57  ;;  %v791_v59 = vpop.xlane.xlu2 %790  ;;  %v788_v60 = vpop.xlane.xlu1 %787 }
 0x1b2   :  { %v803_v61 = vsub.f32 %v720_v34, %v791_v59  ;;  %v802_v0 = vsub.f32 %v694_v32, %v788_v60 }
 0x1b3   :  { %v1639_v62 = vpop.eup %1299  ;;  %v806_v63 = vmul.f32 1.442695, %v798_v58 }
 0x1b4   :  { %v816_v1 = vmul.f32 1.442695, %v803_v61  ;;  %v831_v2 = vsel %vm565_vm1, %v1639_v62, 0.0  ;;  %v1643_v3 = vpop.eup %1301  ;;  %v814_v5 = vmul.f32 1.442695, %v802_v0 }
 0x1b5   :  { %1305 = vpow2.f32 %v806_v63  ;;  %832 = vadd.xlane.f32.xlu0 %v831_v2  ;;  %v840_v4 = vsel %vm565_vm1, %v1643_v3, 0.0  ;;  %v1647_v6 = vpop.eup %1303 }
 0x1b6   :  { %1307 = vpow2.f32 %v816_v1  ;;  %841 = vadd.xlane.f32.xlu2 %v840_v4  ;;  %v843_v9 = vsel %vm565_vm1, %v1647_v6, 0.0 }
 0x1b7   :  { %1309 = vpow2.f32 %v814_v5 }
 0x1bb   :  { %v1649_v7 = vpop.eup %1305 }
 0x1bc   :  { %v1651_v8 = vpop.eup %1307  ;;  %v822_v10 = vsel %vm565_vm1, %v1649_v7, 0.0 }
 0x1bd   :  { %844 = vadd.xlane.f32.xlu0 %v843_v9  ;;  %v837_v11 = vsel %vm565_vm1, %v1651_v8, 0.0  ;;  %v1659_v12 = vpop.eup %1309 }
 0x1be   :  { %838 = vadd.xlane.f32.xlu1 %v837_v11  ;;  %823 = vadd.xlane.f32.xlu2 %v822_v10  ;;  %v834_v13 = vsel %vm565_vm1, %v1659_v12, 0.0 }
 0x1c5   :  { %835 = vadd.xlane.f32.xlu0 %v834_v13 }
 0x21c   :  { %v827_v14 = vpop.xlane.xlu1 %826 }
 0x21d   :  { %1311 = vrcp.f32 %v827_v14  ;;  %v872_v20 = vand.u32 2147483648, %v827_v14  ;;  %v870_v22 = vand.u32 2147483647, %v827_v14  ;;  %vm866_vm3 = vweird.f32 %v827_v14 }
 0x21f   :  { %v873_v28 = vor.u32 1.1754944e-38, %v872_v20  ;;  %vm871_vm5 = vcmp.eq.f32.partialorder %v870_v22, 8.507059e+37 }
 0x220   :  { %v830_v15 = vpop.xlane.xlu2 %829 }
 0x221   :  { %1313 = vrcp.f32 %v830_v15  ;;  %v887_v33 = vand.u32 2147483648, %v830_v15  ;;  %vm881_vm7 = vweird.f32 %v830_v15  ;;  %v885_v36 = vand.u32 2147483647, %v830_v15 }
 0x223   :  { %v1312_v16 = vpop.eup %1311  ;;  %v888_v42 = vor.u32 1.1754944e-38, %v887_v33  ;;  %vm886_vm9 = vcmp.eq.f32.partialorder %v885_v36, 8.507059e+37 }
 0x224   :  { %v862_v17 = vmul.f32 %v1312_v16, %v827_v14  ;;  %vm867_vm2 = vweird.f32 %v1312_v16 }
 0x225   :  { %vm868_vm4 = vmor %vm866_vm3, %vm867_vm2 }
 0x226   :  { %v863_v18 = vsub.f32 1.0, %v862_v17 }
 0x227   :  { %v1314_v19 = vpop.eup %1313 }
 0x228   :  { %v864_v21 = vmul.f32 %v1312_v16, %v863_v18  ;;  %v877_v23 = vmul.f32 %v1314_v19, %v830_v15  ;;  %v833_v24 = vpop.xlane.xlu0 %832  ;;  %vm882_vm6 = vweird.f32 %v1314_v19 }
 0x229   :  { %1315 = vrcp.f32 %v833_v24  ;;  %v842_v27 = vpop.xlane.xlu2 %841  ;;  %vm1664_vm8 = vmor %vm881_vm7, %vm882_vm6  ;;  %v902_v48 = vand.u32 2147483648, %v833_v24  ;;  %vm896_vm11 = vweird.f32 %v833_v24 }
 0x22a   :  { %v865_v25 = vadd.f32 %v1312_v16, %v864_v21  ;;  %v878_v26 = vsub.f32 1.0, %v877_v23  ;;  %1317 = vrcp.f32 %v842_v27  ;;  %v945_v49 = vand.u32 2147483647, %v842_v27 }
 0x22b   :  { %v947_v54 = vand.u32 2147483648, %v842_v27  ;;  %v903_v58 = vor.u32 1.1754944e-38, %v902_v48  ;;  %vm941_vm15 = vweird.f32 %v842_v27 }
 0x22c   :  { %v869_v29 = vsel %vm868_vm4, %v1312_v16, %v865_v25  ;;  %v879_v30 = vmul.f32 %v1314_v19, %v878_v26  ;;  %vm946_vm2 = vcmp.eq.f32.partialorder %v945_v49, 8.507059e+37 }
 0x22d   :  { %v874_v31 = vsel %vm871_vm5, %v873_v28, %v869_v29  ;;  %v948_v5 = vor.u32 1.1754944e-38, %v947_v54 }
 0x22e   :  { %v880_v32 = vadd.f32 %v1314_v19, %v879_v30  ;;  %v875_v34 = vmul.f32 %v1631_v44, %v874_v31  ;;  %v900_v44 = vand.u32 2147483647, %v833_v24 }
 0x22f   :  { %v1316_v35 = vpop.eup %1315 }
 0x230   :  { %v892_v38 = vmul.f32 %v1316_v35, %v833_v24  ;;  %v1668_v39 = vpop.xlane.xlu0 %844  ;;  %1281 = vmatmul.msk.f32.vlgmr.msrb.gmra.mxu1 %vm565_vm1, %v875_v34  ;;  %v1318_v40 = vpop.eup %1317  ;;  %v884_v41 = vsel %vm1664_vm8, %v1314_v19, %v880_v32  ;;  %vm897_vm10 = vweird.f32 %v1316_v35  ;;  %vm901_vm12 = vcmp.eq.f32.partialorder %v900_v44, 8.507059e+37 }
 0x231   :  { %1319 = vrcp.f32 %v1668_v39  ;;  %v937_v45 = vmul.f32 %v1318_v40, %v842_v27  ;;  %v1674_v46 = vpop.xlane.xlu2 %823  ;;  %v1676_v47 = vpop.xlane.xlu1 %838  ;;  %v889_v50 = vsel %vm886_vm9, %v888_v42, %v884_v41  ;;  %vm942_vm13 = vweird.f32 %v1318_v40  ;;  %vm898_vm14 = vmor %vm896_vm11, %vm897_vm10 }
 0x232   :  { %v893_v43 = vsub.f32 1.0, %v892_v38  ;;  %1321 = vrcp.f32 %v1674_v46  ;;  %v960_v59 = vand.u32 2147483647, %v1668_v39  ;;  %v890_v60 = vmul.f32 %v1635_v51, %v889_v50  ;;  %vm943_vm3 = vmor %vm941_vm15, %vm942_vm13 }
 0x233   :  { %v938_v53 = vsub.f32 1.0, %v937_v45  ;;  %1323 = vrcp.f32 %v1676_v47  ;;  %vm956_vm4 = vweird.f32 %v1668_v39  ;;  %v962_v51 = vand.u32 2147483648, %v1668_v39 }
 0x234   :  { %v894_v52 = vmul.f32 %v1316_v35, %v893_v43  ;;  %1282 = vmatmul.msk.f32.vlgmr.msra.gmra.mxu2 %vm565_vm1, %v890_v60  ;;  %vm1690_vm5 = vcmp.eq.f32.partialorder %v960_v59, 8.507059e+37  ;;  %v855_v16 = vand.u32 2147483647, %v1674_v46  ;;  %vm851_vm7 = vweird.f32 %v1674_v46  ;;  %v1190_v59 = vld [vmem:[%s1758_s4 + $0x18] sm:$0xff]  ;;  %v1189_v60 = vld [vmem:[%s1758_s4 + $0x10] sm:$0xff] }
 0x235   :  { %v939_v56 = vmul.f32 %v1318_v40, %v938_v53  ;;  %v857_v21 = vand.u32 2147483648, %v1674_v46  ;;  %v930_v22 = vand.u32 2147483647, %v1676_v47  ;;  %v963_v27 = vor.u32 1.1754944e-38, %v962_v51 }
 0x236   :  { %v895_v55 = vadd.f32 %v1316_v35, %v894_v52  ;;  %vm1704_vm10 = vcmp.eq.f32.partialorder %v855_v16, 8.507059e+37  ;;  %v932_v29 = vand.u32 2147483648, %v1676_v47  ;;  %vm926_vm13 = vweird.f32 %v1676_v47 }
 0x237   :  { %v1320_v57 = vpop.eup %1319  ;;  %v940_v63 = vadd.f32 %v1318_v40, %v939_v56  ;;  %v858_v34 = vor.u32 1.1754944e-38, %v857_v21 }
 0x238   :  { %v899_v61 = vsel %vm898_vm14, %v1316_v35, %v895_v55  ;;  %v952_v0 = vmul.f32 %v1320_v57, %v1668_v39  ;;  %v1683_v1 = vpop.xlane.xlu0 %835  ;;  %v1322_v2 = vpop.eup %1321  ;;  %vm957_vm6 = vweird.f32 %v1320_v57  ;;  %vm931_vm14 = vcmp.eq.f32.partialorder %v930_v22, 8.507059e+37 }
 0x239   :  { %v904_v4 = vsel %vm901_vm12, %v903_v58, %v899_v61  ;;  %1325 = vrcp.f32 %v1683_v1  ;;  %v944_v9 = vsel %vm943_vm3, %v1318_v40, %v940_v63  ;;  %v847_v11 = vmul.f32 %v1322_v2, %v1674_v46  ;;  %v1324_v13 = vpop.eup %1323  ;;  %vm958_vm9 = vmor %vm956_vm4, %vm957_vm6  ;;  %v1188_v61 = vld [vmem:[%s1758_s4 + $0x8] sm:$0xff]  ;;  %v1187_v63 = vld [vmem:[%s1758_s4] sm:$0xff] }
 0x23a   :  { %v953_v10 = vsub.f32 1.0, %v952_v0  ;;  %v949_v14 = vsel %vm946_vm2, %v948_v5, %v944_v9  ;;  %v905_v17 = vmul.f32 %v1639_v62, %v904_v4  ;;  %v922_v20 = vmul.f32 %v1324_v13, %v1676_v47 }
 0x23b   :  { %v848_v19 = vsub.f32 1.0, %v847_v11  ;;  %v950_v23 = vmul.f32 %v1643_v3, %v949_v14  ;;  %vm852_vm8 = vweird.f32 %v1322_v2  ;;  %vm927_vm11 = vweird.f32 %v1324_v13 }
 0x23c   :  { %v954_v18 = vmul.f32 %v1320_v57, %v953_v10  ;;  %1283 = vmatmul.msk.f32.vlgmr.msra.gmra.mxu3 %vm565_vm1, %v905_v17  ;;  %v923_v26 = vsub.f32 1.0, %v922_v20  ;;  %vm853_vm12 = vmor %vm851_vm7, %vm852_vm8  ;;  %v933_v40 = vor.u32 1.1754944e-38, %v932_v29  ;;  %v915_v41 = vand.u32 2147483647, %v1683_v1 }
 0x23d   :  { %v849_v25 = vmul.f32 %v1322_v2, %v848_v19  ;;  %1286 = vmatmul.msk.f32.vlgmr.msrb.gmra.mxu2 %vm565_vm1, %v950_v23  ;;  %vm928_vm15 = vmor %vm926_vm13, %vm927_vm11  ;;  %v917_v42 = vand.u32 2147483648, %v1683_v1  ;;  %vm911_vm3 = vweird.f32 %v1683_v1  ;;  %vm1161_vm6 = vcmask 195712  }
 0x23e   :  { %v955_v24 = vadd.f32 %v1320_v57, %v954_v18  ;;  %v924_v32 = vmul.f32 %v1324_v13, %v923_v26  ;;  %vm1167_vm7 = vcmask 261312  }
 0x23f   :  { %v1326_v62 = vpop.eup %1325  ;;  %v850_v31 = vadd.f32 %v1322_v2, %v849_v25  ;;  %v918_v48 = vor.u32 1.1754944e-38, %v917_v42 }
 0x240   :  { %v959_v30 = vsel %vm958_vm9, %v1320_v57, %v955_v24  ;;  %v907_v3 = vmul.f32 %v1326_v62, %v1683_v1  ;;  %v925_v36 = vadd.f32 %v1324_v13, %v924_v32  ;;  %vm912_vm2 = vweird.f32 %v1326_v62 }
 0x241   :  { %v964_v33 = vsel %vm1690_vm5, %v963_v27, %v959_v30  ;;  %v854_v35 = vsel %vm853_vm12, %v1322_v2, %v850_v31  ;;  %vm913_vm4 = vmor %vm911_vm3, %vm912_vm2  ;;  %vm916_vm5 = vcmp.eq.f32.partialorder %v915_v41, 8.507059e+37 }
 0x242   :  { %v908_v37 = vsub.f32 1.0, %v907_v3  ;;  %v965_v38 = vmul.f32 %v1647_v6, %v964_v33  ;;  %v859_v39 = vsel %vm1704_vm10, %v858_v34, %v854_v35  ;;  %v929_v43 = vsel %vm928_vm15, %v1324_v13, %v925_v36 }
 0x243   :  { %v860_v45 = vmul.f32 %v1649_v7, %v859_v39  ;;  %v934_v46 = vsel %vm931_vm14, %v933_v40, %v929_v43 }
 0x244   :  { %v909_v44 = vmul.f32 %v1326_v62, %v908_v37  ;;  %1287 = vmatmul.msk.f32.vlgmr.msrb.gmra.mxu3 %vm565_vm1, %v965_v38  ;;  %v935_v6 = vmul.f32 %v1651_v8, %v934_v46 }
 0x245   :  { %1280 = vmatmul.msk.f32.vlgmr.msrb.gmra.mxu0 %vm565_vm1, %v860_v45 }
 0x246   :  { %v910_v47 = vadd.f32 %v1326_v62, %v909_v44  ;;  %1285 = vmatmul.msk.f32.vlgmr.msra.gmra.mxu1 %vm565_vm1, %v935_v6  ;;  %1209 = vmatpush.msrb.mxu0 %v1190_v59 }
 0x248   :  { %v914_v49 = vsel %vm913_vm4, %v1326_v62, %v910_v47  ;;  %1210 = vmatpush.msrb.mxu0 %v1189_v60 }
 0x249   :  { %v919_v50 = vsel %vm916_vm5, %v918_v48, %v914_v49 }
 0x24a   :  { %v920_v52 = vmul.f32 %v1659_v12, %v919_v50  ;;  %1211 = vmatpush.msrb.mxu0 %v1188_v61 }
 0x24c   :  { %1212 = vmatpush.msrb.mxu0 %v1187_v63 }
 0x24d   :  { %1284 = vmatmul.msk.f32.vlgmr.msra.gmra.mxu0 %vm565_vm1, %v920_v52 }
 0x2ad   :  { %v1009_v7 = vpop.f32.mrf.mxu1 }
 0x2ae   :  { %1152 = vrot.lane.b32.xlu1 %v1009_v7, %s1353_s5 }
 0x2b7   :  { %v1032_v53 = vpop.f32.mrf.mxu2 }
 0x2b8   :  { %1158 = vrot.lane.b32.xlu2 %v1032_v53, %s1354_s24 }
 0x2bf   :  { %v1055_v54 = vpop.f32.mrf.mxu3 }
 0x2c0   :  { %1164 = vrot.lane.b32.xlu0 %v1055_v54, %s1355_s25  ;;  %v1124_v55 = vpop.f32.mrf.mxu2 }
 0x2c1   :  { %1176 = vrot.lane.b32.xlu1 %v1124_v55, %s1354_s24 }
 0x2c2   :  { %v986_v8 = vpop.f32.mrf.mxu0 }
 0x2c3   :  { %1150 = vst.msk [vmem:[#allocation2] sm:$0xff] %vm565_vm1, %v986_v8  ;;  %v1101_v56 = vpop.f32.mrf.mxu1 }
 0x2c4   :  { %1171 = vrot.lane.b32.xlu2 %v1101_v56, %s1353_s5 }
 0x2c7   :  { %v1147_v12 = vpop.f32.mrf.mxu3 }
 0x2c8   :  { %1181 = vrot.lane.b32.xlu0 %v1147_v12, %s1355_s25 }
 0x2ca   :  { %v1078_v57 = vpop.f32.mrf.mxu0 }
 0x2cb   :  { %1169 = vst.msk [vmem:[#allocation2 + $0x8] sm:$0xff] %vm565_vm1, %v1078_v57  ;;  %vm1155_vm1 = vcmask 130112  }
 0x312   :  { %v1159_v58 = vpop.permute.xlu2 %1158 }
 0x31e   :  { %v1172_v0 = vpop.permute.xlu2 %1171 }
 0x31f   :  { %1174 = vst.msk [vmem:[#allocation2 + $0x8] sm:$0xff] %vm1155_vm1, %v1172_v0 }
 0x320   :  { %v1153_v1 = vpop.permute.xlu1 %1152 }
 0x321   :  { %1156 = vst.msk [vmem:[#allocation2] sm:$0xff] %vm1155_vm1, %v1153_v1 }
 0x322   :  { %1162 = vst.msk [vmem:[#allocation2] sm:$0xff] %vm1161_vm6, %v1159_v58 }
 0x332   :  { %v1165_v2 = vpop.permute.xlu0 %1164 }
 0x333   :  { %1168 = vst.msk [vmem:[#allocation2] sm:$0xff] %vm1167_vm7, %v1165_v2  ;;  %v1177_v4 = vpop.permute.xlu1 %1176 }
 0x334   :  { %1179 = vst.msk [vmem:[#allocation2 + $0x8] sm:$0xff] %vm1161_vm6, %v1177_v4 }
 0x33a   :  { %v1182_v5 = vpop.permute.xlu0 %1181  ;;  %v1185_v9 = vld [vmem:[#allocation2] sm:$0xff] }
 0x33b   :  { %1184 = vst.msk [vmem:[#allocation2 + $0x8] sm:$0xff] %vm1167_vm7, %v1182_v5  ;;  %1288 = vmatmul.msk.f32.vlgmr.msrb.gmra.mxu0 %vm42_vm0, %v1185_v9 }
 0x342   :  { %v1186_v10 = vld [vmem:[#allocation2 + $0x8] sm:$0xff] }
 0x343   :  { %1289 = vmatmul.msk.f32.gmra.mxu0 %vm42_vm0, %v1186_v10 }
 0x3b8   :  { %v1214_v51 = vpop.f32.mrf.mxu0 }
 0x3b9   :  { %1220 = vst.msk [vmem:[#allocation3] sm:$0xff] %vm42_vm0, %v1214_v51 }
 0x3c0   :  { %v1217_v11 = vpop.f32.mrf.mxu0 }
 0x3c1   :  { %1221 = vst.msk [vmem:[#allocation3 + $0x8] sm:$0xff] %vm42_vm0, %v1217_v11 }
 0x3c2   :  { %1234 = dma.vmem_to_hbm [thread:$0]  %s1227_s12, 256, %s1229_s10, [#allocation4], %s1357_s13, %s1357_s13, %s1353_s5  }
 0x3c3   :  { %1351 = dma.done.wait [#allocation4], 256  }
 0x3c4   :  { %1352 = vsyncadd [#allocation4], 4294967040 }
 0x3c5   :  { %1239 = vsyncpa [#allocation4], 1 }

</bundles_post_ra>
